<compile_context>
chip_gen: v6e
topology: v6e:2x2x1
jax: 0.10.0
libtpu: 0.0.40
codegen_flags: <defaults>
</compile_context>

<pallas_src>
import math
from dataclasses import dataclass

import jax
import jax.numpy as jnp
from jax.experimental import pallas as pl
from jax.experimental.pallas import tpu as pltpu


@dataclass
class Config:
    ln_update_bias_only: bool = False


def _round_up(x, m):
    return ((x + m - 1) // m) * m


def _pick_tile(n, prefs):
    for p in prefs:
        if n >= p and n % p == 0:
            return p
    return n


def _make_descent_kernel(use_softmax: bool, cache_kv: bool):
    """Flash-style (online-softmax) descent kernel; grid = (B, nq, nk)."""

    def body(mask_ref, hq_ref, hkv_ref, pq_ref, pkv_ref,
             wq_ref, wk_ref, wv_ref, wo_ref, o_ref,
             q_sc, m_sc, l_sc, acc_sc, k_cache, v_cache):
        qi = pl.program_id(1)
        ki = pl.program_id(2)
        nk = pl.num_programs(2)

        @pl.when(ki == 0)
        def _init():
            # q for this (batch, q-tile); 1/sqrt(D) already folded into Wq.
            q_sc[...] = jnp.dot(pq_ref[0], wq_ref[...],
                                preferred_element_type=jnp.float32
                                ).astype(jnp.bfloat16)
            if use_softmax:
                m_sc[...] = jnp.full_like(m_sc, -jnp.inf)
                l_sc[...] = jnp.zeros_like(l_sc)
            acc_sc[...] = jnp.zeros_like(acc_sc)

        if cache_kv:
            # Project K/V only while sweeping the first q tile of each batch;
            # keep them resident in VMEM for all remaining q tiles.
            @pl.when(qi == 0)
            def _project_kv():
                k_cache[ki] = jnp.dot(pkv_ref[0], wk_ref[...],
                                      preferred_element_type=jnp.float32
                                      ).astype(jnp.bfloat16)
                v_cache[ki] = jnp.dot(hkv_ref[0], wv_ref[...],
                                      preferred_element_type=jnp.float32
                                      ).astype(jnp.bfloat16)

            k = k_cache[ki]
            v = v_cache[ki]
        else:
            k = jnp.dot(pkv_ref[0], wk_ref[...],
                        preferred_element_type=jnp.float32).astype(jnp.bfloat16)
            v = jnp.dot(hkv_ref[0], wv_ref[...],
                        preferred_element_type=jnp.float32).astype(jnp.bfloat16)

        # scores = q @ k.T (contract over hidden dim; no explicit transpose)
        s = jax.lax.dot_general(q_sc[...], k, (((1,), (1,)), ((), ())),
                                preferred_element_type=jnp.float32)

        if use_softmax:
            # additive mask bias (0 / -1e9) precomputed on the host in bf16
            s = s + mask_ref[0].astype(jnp.float32)
            m_new = jnp.maximum(m_sc[...], jnp.max(s, axis=-1, keepdims=True))
            alpha = jnp.exp(m_sc[...] - m_new)
            p = jnp.exp(s - m_new)
            l_sc[...] = alpha * l_sc[...] + jnp.sum(p, axis=-1, keepdims=True)
            acc_sc[...] = alpha * acc_sc[...] + jnp.dot(
                p.astype(jnp.bfloat16), v, preferred_element_type=jnp.float32)
            m_sc[...] = m_new
        else:
            # linear (unnormalized) attention with multiplicative mask
            p = s * mask_ref[0].astype(jnp.float32)
            acc_sc[...] = acc_sc[...] + jnp.dot(
                p.astype(jnp.bfloat16), v, preferred_element_type=jnp.float32)

        @pl.when(ki == nk - 1)
        def _finalize():
            ctx = acc_sc[...]
            if use_softmax:
                ctx = ctx * pl.reciprocal(l_sc[...], approx=True)
            upd = jnp.dot(ctx.astype(jnp.bfloat16), wo_ref[...],
                          preferred_element_type=jnp.float32)
            o_ref[0] = (hq_ref[0].astype(jnp.float32) + upd).astype(o_ref.dtype)

    if cache_kv:
        def kernel(mask_ref, hq_ref, hkv_ref, pq_ref, pkv_ref,
                   wq_ref, wk_ref, wv_ref, wo_ref, o_ref,
                   q_sc, k_cache, v_cache, m_sc, l_sc, acc_sc):
            body(mask_ref, hq_ref, hkv_ref, pq_ref, pkv_ref,
                 wq_ref, wk_ref, wv_ref, wo_ref, o_ref,
                 q_sc, m_sc, l_sc, acc_sc, k_cache, v_cache)
    else:
        def kernel(mask_ref, hq_ref, hkv_ref, pq_ref, pkv_ref,
                   wq_ref, wk_ref, wv_ref, wo_ref, o_ref,
                   q_sc, m_sc, l_sc, acc_sc):
            body(mask_ref, hq_ref, hkv_ref, pq_ref, pkv_ref,
                 wq_ref, wk_ref, wv_ref, wo_ref, o_ref,
                 q_sc, m_sc, l_sc, acc_sc, None, None)
    return kernel


class LayerNormDescent:
    """JAX/Pallas port of tint_main/utils/layernorm/backward.py::LayerNormDescent."""

    def __init__(self, config: Config, din: int, use_softmax: bool,
                 memory_index: int = -1, debug_zero: bool = False, seed: int = 0):
        self.config = config
        self.din = din
        self.dp = _round_up(din, 128)     # lane-dense hidden dim inside the kernel
        self.use_softmax = use_softmax
        self.memory_index = memory_index  # TODO(synk): activation-memory path not modeled
        self.debug_zero = debug_zero

        key = jax.random.PRNGKey(seed)
        kq, kk, kv, ko = jax.random.split(key, 4)
        std = 1.0 / math.sqrt(din)

        def init(k, scale=1.0):
            w = jax.random.normal(k, (din, din), jnp.float32) * std * scale
            wp = jnp.zeros((self.dp, self.dp), jnp.float32).at[:din, :din].set(w)
            return wp.astype(jnp.bfloat16)

        # 1/sqrt(D) score scaling folded into Wq (one-time, host side).
        self.wq = init(kq, scale=1.0 / math.sqrt(din))
        self.wk = init(kk)
        self.wv = init(kv)
        self.wo = init(ko)

    def __call__(self, hidden_states, position_states, attention_mask,
                 activation_memory=None, icl_mask=None):
        # TODO(synk): activation_memory / icl_mask paths of LinearDescent not modeled.
        B, T, D = hidden_states.shape
        assert D == self.din

        if self.debug_zero:
            # upd is identically zero -> output == hidden_states; skip all compute.
            return hidden_states

        Dp = self.dp
        pad = Dp - D
        h = hidden_states
        p = position_states
        if pad:
            h = jnp.pad(h, ((0, 0), (0, 0), (0, pad)))
            p = jnp.pad(p, ((0, 0), (0, 0), (0, pad)))
        h_bf = h.astype(jnp.bfloat16)   # stream feeding the v projection
        p_bf = p.astype(jnp.bfloat16)   # stream feeding the q / k projections

        mask = attention_mask
        if mask.ndim == 2:
            mask = mask[None]
        shared_mask = mask.shape[0] == 1        # one (1,T,T) mask shared across batch
        if self.use_softmax:
            # additive score bias precomputed once on host (binary mask assumed)
            mask = jnp.where(mask > 0.5, 0.0, -1e9).astype(jnp.bfloat16)
        else:
            mask = mask.astype(jnp.float32)

        tq = _pick_tile(T, (512, 256, 128))
        tk = _pick_tile(T, (256, 128))
        nq, nk = T // tq, T // tk
        grid = (B, nq, nk)

        # Keep the full projected K/V for one batch resident in VMEM when it fits.
        cache_bytes = 2 * T * Dp * 2            # K + V, bf16
        cache_kv = cache_bytes <= (8 << 20)

        if shared_mask:
            mask_idx = lambda b, qi, ki: (0, qi, ki)
        else:
            mask_idx = lambda b, qi, ki: (b, qi, ki)

        if cache_kv:
            # Pin the K/V HBM streams to block 0 once the VMEM cache is full
            # (qi > 0) so they are not re-fetched for later q tiles.
            def kv_idx(b, qi, ki):
                keep = 1 - jnp.minimum(qi, 1)   # 1 when qi == 0 else 0
                return (b, ki * keep, 0)
        else:
            kv_idx = lambda b, qi, ki: (b, ki, 0)

        in_specs = [
            pl.BlockSpec((1, tq, tk), mask_idx),                       # mask / bias
            pl.BlockSpec((1, tq, Dp), lambda b, qi, ki: (b, qi, 0)),   # hidden (residual)
            pl.BlockSpec((1, tk, Dp), kv_idx),                         # hidden bf16 (v)
            pl.BlockSpec((1, tq, Dp), lambda b, qi, ki: (b, qi, 0)),   # pos bf16 (q)
            pl.BlockSpec((1, tk, Dp), kv_idx),                         # pos bf16 (k)
            pl.BlockSpec((Dp, Dp), lambda b, qi, ki: (0, 0)),          # Wq
            pl.BlockSpec((Dp, Dp), lambda b, qi, ki: (0, 0)),          # Wk
            pl.BlockSpec((Dp, Dp), lambda b, qi, ki: (0, 0)),          # Wv
            pl.BlockSpec((Dp, Dp), lambda b, qi, ki: (0, 0)),          # Wo
        ]
        out_specs = pl.BlockSpec((1, tq, Dp), lambda b, qi, ki: (b, qi, 0))

        scratch_shapes = [pltpu.VMEM((tq, Dp), jnp.bfloat16)]          # cached q tile
        if cache_kv:
            scratch_shapes += [pltpu.VMEM((nk, tk, Dp), jnp.bfloat16), # K cache
                               pltpu.VMEM((nk, tk, Dp), jnp.bfloat16)] # V cache
        scratch_shapes += [pltpu.VMEM((tq, 1), jnp.float32),           # running max
                           pltpu.VMEM((tq, 1), jnp.float32),           # running denom
                           pltpu.VMEM((tq, Dp), jnp.float32)]          # output accumulator

        # Rough double-buffered VMEM footprint; raise the scoped limit only if needed.
        def nbytes(shape, dt):
            return math.prod(shape) * jnp.dtype(dt).itemsize

        est = 2 * (nbytes((tq, tk), mask.dtype)
                   + nbytes((tq, Dp), h.dtype)
                   + 2 * nbytes((tk, Dp), jnp.bfloat16)
                   + nbytes((tq, Dp), jnp.bfloat16)
                   + 4 * nbytes((Dp, Dp), jnp.bfloat16)
                   + nbytes((tq, Dp), hidden_states.dtype))
        est += (nbytes((tq, Dp), jnp.bfloat16) + nbytes((tq, Dp), jnp.float32)
                + 2 * nbytes((tq, 1), jnp.float32))
        if cache_kv:
            est += cache_bytes

        # With the VMEM KV cache, keep the q-tile axis "arbitrary" so the cache
        # fill (qi == 0) always precedes its consumers on the same core.
        dims = ("parallel", "arbitrary", "arbitrary") if cache_kv \
            else ("parallel", "parallel", "arbitrary")
        compiler_kwargs = dict(dimension_semantics=dims)
        if est > 28 * (1 << 20):
            try:
                cap = pltpu.get_tpu_info().vmem_capacity_bytes
            except Exception:
                cap = 64 << 20   # conservative (v7x physical VMEM)
            compiler_kwargs["vmem_limit_bytes"] = int(min(est * 1.4, 0.9 * cap))

        kernel = _make_descent_kernel(self.use_softmax, cache_kv)

        out = pl.pallas_call(
            kernel,
            out_shape=jax.ShapeDtypeStruct((B, T, Dp), hidden_states.dtype),
            grid_spec=pltpu.PrefetchScalarGridSpec(
                num_scalar_prefetch=0,
                grid=grid,
                in_specs=in_specs,
                out_specs=out_specs,
                scratch_shapes=scratch_shapes),
            compiler_params=pltpu.CompilerParams(**compiler_kwargs),
        )(mask, h, h_bf, p_bf, p_bf,
          self.wq, self.wk, self.wv, self.wo)

        if pad:
            out = out[..., :D]
        return out


def _reference(module, hidden_states, position_states, attention_mask):
    """Pure-JAX mirror of the kernel math (bf16 MXU inputs, f32 accumulation)."""
    B, T, D = hidden_states.shape
    Dp = module.dp
    pad = Dp - D
    h = jnp.pad(hidden_states, ((0, 0), (0, 0), (0, pad))) if pad else hidden_states
    p = jnp.pad(position_states, ((0, 0), (0, 0), (0, pad))) if pad else position_states
    hb, pb = h.astype(jnp.bfloat16), p.astype(jnp.bfloat16)
    q = jnp.einsum('btd,de->bte', pb, module.wq,
                   preferred_element_type=jnp.float32).astype(jnp.bfloat16)
    k = jnp.einsum('btd,de->bte', pb, module.wk,
                   preferred_element_type=jnp.float32).astype(jnp.bfloat16)
    v = jnp.einsum('btd,de->bte', hb, module.wv,
                   preferred_element_type=jnp.float32).astype(jnp.bfloat16)
    s = jnp.einsum('bqd,bkd->bqk', q, k, preferred_element_type=jnp.float32)
    mask = attention_mask if attention_mask.ndim == 3 else attention_mask[None]
    if module.use_softmax:
        s = s + jnp.where(mask > 0.5, 0.0, -1e9)
        e = jnp.exp(s - jnp.max(s, axis=-1, keepdims=True))
        l = jnp.sum(e, axis=-1, keepdims=True)
        ctx = jnp.einsum('bqk,bkd->bqd', e.astype(jnp.bfloat16), v,
                         preferred_element_type=jnp.float32) / l
    else:
        pmat = s * mask
        ctx = jnp.einsum('bqk,bkd->bqd', pmat.astype(jnp.bfloat16), v,
                         preferred_element_type=jnp.float32)
    upd = jnp.einsum('btd,de->bte', ctx.astype(jnp.bfloat16), module.wo,
                     preferred_element_type=jnp.float32)
    out = h.astype(jnp.float32) + upd
    return out[..., :D].astype(hidden_states.dtype)


if __name__ == "__main__":
    B, T, D = 2, 8, 32

    key = jax.random.PRNGKey(0)
    kh, kp = jax.random.split(key)
    hidden_states = jax.random.normal(kh, (B, T, D), jnp.float32)
    position_states = jax.random.normal(kp, (B, T, D), jnp.float32)
    # Single shared causal mask (1, T, T): NOT replicated per batch.
    attention_mask = jnp.tril(jnp.ones((T, T), jnp.float32))[None]

    module = LayerNormDescent(Config(ln_update_bias_only=False), din=D,
                              use_softmax=True, memory_index=-1, debug_zero=False)

    out = module(hidden_states, position_states, attention_mask)
    jax.block_until_ready(out)

    assert out.shape == (B, T, D) and out.dtype == jnp.float32
    assert bool(jnp.all(jnp.isfinite(out)))

    ref = _reference(module, hidden_states, position_states, attention_mask)
    err = float(jnp.max(jnp.abs(out - ref)))
    assert err < 1e-1, f"max |kernel - reference| = {err}"
    print("KERNEL_OK")
</pallas_src>

<mosaic_0001>
module attributes {stable_mosaic.version = 11 : i64} {
  func.func @kernel(%arg0: i32, %arg1: i32, %arg2: i32, %arg3: memref<1x8x8xbf16, #tpu.memory_space<vmem>>, %arg4: memref<1x8x128xf32, #tpu.memory_space<vmem>>, %arg5: memref<1x8x128xbf16, #tpu.memory_space<vmem>>, %arg6: memref<1x8x128xbf16, #tpu.memory_space<vmem>>, %arg7: memref<1x8x128xbf16, #tpu.memory_space<vmem>>, %arg8: memref<128x128xbf16, #tpu.memory_space<vmem>>, %arg9: memref<128x128xbf16, #tpu.memory_space<vmem>>, %arg10: memref<128x128xbf16, #tpu.memory_space<vmem>>, %arg11: memref<128x128xbf16, #tpu.memory_space<vmem>>, %arg12: memref<1x8x128xf32, #tpu.memory_space<vmem>>, %arg13: memref<8x128xbf16, #tpu.memory_space<vmem>>, %arg14: memref<1x8x128xbf16, #tpu.memory_space<vmem>>, %arg15: memref<1x8x128xbf16, #tpu.memory_space<vmem>>, %arg16: memref<8x1xf32, #tpu.memory_space<vmem>>, %arg17: memref<8x1xf32, #tpu.memory_space<vmem>>, %arg18: memref<8x128xf32, #tpu.memory_space<vmem>>) attributes {dimension_semantics = [#tpu.dimension_semantics<parallel>, #tpu.dimension_semantics<arbitrary>, #tpu.dimension_semantics<arbitrary>], iteration_bounds = array<i64: 2, 1, 1>, scalar_prefetch = 0 : i64, scratch_operands = 6 : i64, tpu.core_type = #tpu.core_type<tc>, window_params = [{transform_indices = @transform_0, window_bounds = array<i64: 1, 8, 8>}, {transform_indices = @transform_1, window_bounds = array<i64: 1, 8, 128>}, {transform_indices = @transform_2, window_bounds = array<i64: 1, 8, 128>}, {transform_indices = @transform_3, window_bounds = array<i64: 1, 8, 128>}, {transform_indices = @transform_4, window_bounds = array<i64: 1, 8, 128>}, {pipeline_mode = #tpu.pipeline_mode<synchronous>, transform_indices = @transform_5, window_bounds = array<i64: 128, 128>}, {pipeline_mode = #tpu.pipeline_mode<synchronous>, transform_indices = @transform_6, window_bounds = array<i64: 128, 128>}, {pipeline_mode = #tpu.pipeline_mode<synchronous>, transform_indices = @transform_7, window_bounds = array<i64: 128, 128>}, {pipeline_mode = #tpu.pipeline_mode<synchronous>, transform_indices = @transform_8, window_bounds = array<i64: 128, 128>}, {transform_indices = @transform_9, window_bounds = array<i64: 1, 8, 128>}]} {
    %c0_i32 = arith.constant 0 : i32
    %0 = arith.cmpi eq, %arg2, %c0_i32 : i32
    %1 = arith.extui %0 : i1 to i32
    %c0_i32_0 = arith.constant 0 : i32
    %2 = arith.cmpi ne, %1, %c0_i32_0 : i32
    scf.if %2 {
      %c0_30 = arith.constant 0 : index
      %c0_31 = arith.constant 0 : index
      %c0_32 = arith.constant 0 : index
      %45 = vector.load %arg6[%c0_30, %c0_31, %c0_32] : memref<1x8x128xbf16, #tpu.memory_space<vmem>>, vector<1x8x128xbf16>
      %46 = vector.shape_cast %45 : vector<1x8x128xbf16> to vector<8x128xbf16>
      %c0_33 = arith.constant 0 : index
      %c0_34 = arith.constant 0 : index
      %47 = vector.load %arg8[%c0_33, %c0_34] : memref<128x128xbf16, #tpu.memory_space<vmem>>, vector<128x128xbf16>
      %cst_35 = arith.constant dense<0.000000e+00> : vector<8x128xf32>
      %48 = tpu.matmul %46, %47, %cst_35 {dimension_numbers = #tpu.dot_dimension_numbers<[1], [0], [0], [1], [0, 0, 1, 1], [], []>} : vector<8x128xbf16>, vector<128x128xbf16>, vector<8x128xf32> -> vector<8x128xf32>
      %49 = arith.truncf %48 : vector<8x128xf32> to vector<8x128xbf16>
      %c0_36 = arith.constant 0 : index
      %c0_37 = arith.constant 0 : index
      %50 = vector.load %arg13[%c0_36, %c0_37] : memref<8x128xbf16, #tpu.memory_space<vmem>>, vector<8x128xbf16>
      tpu.vector_store %arg13[%c0_36, %c0_37], %49 {strides = array<i32>} : memref<8x128xbf16, #tpu.memory_space<vmem>>, vector<8x128xbf16>,
      %cst_38 = arith.constant 0xFF800000 : f32
      %51 = vector.broadcast %cst_38 : f32 to vector<8x1xf32>
      %c0_39 = arith.constant 0 : index
      %c0_40 = arith.constant 0 : index
      %52 = vector.load %arg16[%c0_39, %c0_40] : memref<8x1xf32, #tpu.memory_space<vmem>>, vector<8x1xf32>
      tpu.vector_store %arg16[%c0_39, %c0_40], %51 {strides = array<i32>} : memref<8x1xf32, #tpu.memory_space<vmem>>, vector<8x1xf32>,
      %cst_41 = arith.constant 0.000000e+00 : f32
      %53 = vector.broadcast %cst_41 : f32 to vector<8x1xf32>
      %c0_42 = arith.constant 0 : index
      %c0_43 = arith.constant 0 : index
      %54 = vector.load %arg17[%c0_42, %c0_43] : memref<8x1xf32, #tpu.memory_space<vmem>>, vector<8x1xf32>
      tpu.vector_store %arg17[%c0_42, %c0_43], %53 {strides = array<i32>} : memref<8x1xf32, #tpu.memory_space<vmem>>, vector<8x1xf32>,
      %cst_44 = arith.constant 0.000000e+00 : f32
      %55 = vector.broadcast %cst_44 : f32 to vector<8x128xf32>
      %c0_45 = arith.constant 0 : index
      %c0_46 = arith.constant 0 : index
      %56 = vector.load %arg18[%c0_45, %c0_46] : memref<8x128xf32, #tpu.memory_space<vmem>>, vector<8x128xf32>
      tpu.vector_store %arg18[%c0_45, %c0_46], %55 {strides = array<i32>} : memref<8x128xf32, #tpu.memory_space<vmem>>, vector<8x128xf32>,
    } else {
    }
    %c0_i32_1 = arith.constant 0 : i32
    %3 = arith.cmpi eq, %arg1, %c0_i32_1 : i32
    %4 = arith.extui %3 : i1 to i32
    %c0_i32_2 = arith.constant 0 : i32
    %5 = arith.cmpi ne, %4, %c0_i32_2 : i32
    scf.if %5 {
      %c0_30 = arith.constant 0 : index
      %c0_31 = arith.constant 0 : index
      %c0_32 = arith.constant 0 : index
      %45 = vector.load %arg7[%c0_30, %c0_31, %c0_32] : memref<1x8x128xbf16, #tpu.memory_space<vmem>>, vector<1x8x128xbf16>
      %46 = vector.shape_cast %45 : vector<1x8x128xbf16> to vector<8x128xbf16>
      %c0_33 = arith.constant 0 : index
      %c0_34 = arith.constant 0 : index
      %47 = vector.load %arg9[%c0_33, %c0_34] : memref<128x128xbf16, #tpu.memory_space<vmem>>, vector<128x128xbf16>
      %cst_35 = arith.constant dense<0.000000e+00> : vector<8x128xf32>
      %48 = tpu.matmul %46, %47, %cst_35 {dimension_numbers = #tpu.dot_dimension_numbers<[1], [0], [0], [1], [0, 0, 1, 1], [], []>} : vector<8x128xbf16>, vector<128x128xbf16>, vector<8x128xf32> -> vector<8x128xf32>
      %49 = arith.truncf %48 : vector<8x128xf32> to vector<8x128xbf16>
      %50 = arith.index_cast %arg2 : i32 to index
      %c0_36 = arith.constant 0 : index
      %c0_37 = arith.constant 0 : index
      %51 = vector.load %arg14[%50, %c0_36, %c0_37] : memref<1x8x128xbf16, #tpu.memory_space<vmem>>, vector<1x8x128xbf16>
      %52 = vector.shape_cast %51 : vector<1x8x128xbf16> to vector<8x128xbf16>
      %53 = vector.shape_cast %49 : vector<8x128xbf16> to vector<1x8x128xbf16>
      tpu.vector_store %arg14[%50, %c0_36, %c0_37], %53 {strides = array<i32>} : memref<1x8x128xbf16, #tpu.memory_space<vmem>>, vector<1x8x128xbf16>,
      %c0_38 = arith.constant 0 : index
      %c0_39 = arith.constant 0 : index
      %c0_40 = arith.constant 0 : index
      %54 = vector.load %arg5[%c0_38, %c0_39, %c0_40] : memref<1x8x128xbf16, #tpu.memory_space<vmem>>, vector<1x8x128xbf16>
      %55 = vector.shape_cast %54 : vector<1x8x128xbf16> to vector<8x128xbf16>
      %c0_41 = arith.constant 0 : index
      %c0_42 = arith.constant 0 : index
      %56 = vector.load %arg10[%c0_41, %c0_42] : memref<128x128xbf16, #tpu.memory_space<vmem>>, vector<128x128xbf16>
      %cst_43 = arith.constant dense<0.000000e+00> : vector<8x128xf32>
      %57 = tpu.matmul %55, %56, %cst_43 {dimension_numbers = #tpu.dot_dimension_numbers<[1], [0], [0], [1], [0, 0, 1, 1], [], []>} : vector<8x128xbf16>, vector<128x128xbf16>, vector<8x128xf32> -> vector<8x128xf32>
      %58 = arith.truncf %57 : vector<8x128xf32> to vector<8x128xbf16>
      %59 = arith.index_cast %arg2 : i32 to index
      %c0_44 = arith.constant 0 : index
      %c0_45 = arith.constant 0 : index
      %60 = vector.load %arg15[%59, %c0_44, %c0_45] : memref<1x8x128xbf16, #tpu.memory_space<vmem>>, vector<1x8x128xbf16>
      %61 = vector.shape_cast %60 : vector<1x8x128xbf16> to vector<8x128xbf16>
      %62 = vector.shape_cast %58 : vector<8x128xbf16> to vector<1x8x128xbf16>
      tpu.vector_store %arg15[%59, %c0_44, %c0_45], %62 {strides = array<i32>} : memref<1x8x128xbf16, #tpu.memory_space<vmem>>, vector<1x8x128xbf16>,
    } else {
    }
    %6 = arith.index_cast %arg2 : i32 to index
    %c0 = arith.constant 0 : index
    %c0_3 = arith.constant 0 : index
    %7 = vector.load %arg14[%6, %c0, %c0_3] : memref<1x8x128xbf16, #tpu.memory_space<vmem>>, vector<1x8x128xbf16>
    %8 = vector.shape_cast %7 : vector<1x8x128xbf16> to vector<8x128xbf16>
    %9 = arith.index_cast %arg2 : i32 to index
    %c0_4 = arith.constant 0 : index
    %c0_5 = arith.constant 0 : index
    %10 = vector.load %arg15[%9, %c0_4, %c0_5] : memref<1x8x128xbf16, #tpu.memory_space<vmem>>, vector<1x8x128xbf16>
    %11 = vector.shape_cast %10 : vector<1x8x128xbf16> to vector<8x128xbf16>
    %c0_6 = arith.constant 0 : index
    %c0_7 = arith.constant 0 : index
    %12 = vector.load %arg13[%c0_6, %c0_7] : memref<8x128xbf16, #tpu.memory_space<vmem>>, vector<8x128xbf16>
    %cst = arith.constant dense<0.000000e+00> : vector<8x8xf32>
    %13 = tpu.matmul %12, %8, %cst {dimension_numbers = #tpu.dot_dimension_numbers<[1], [1], [0], [0], [0, 0, 1, 0], [], []>} : vector<8x128xbf16>, vector<8x128xbf16>, vector<8x8xf32> -> vector<8x8xf32>
    %c0_8 = arith.constant 0 : index
    %c0_9 = arith.constant 0 : index
    %c0_10 = arith.constant 0 : index
    %14 = vector.load %arg3[%c0_8, %c0_9, %c0_10] : memref<1x8x8xbf16, #tpu.memory_space<vmem>>, vector<1x8x8xbf16>
    %15 = vector.shape_cast %14 : vector<1x8x8xbf16> to vector<8x8xbf16>
    %16 = arith.extf %15 : vector<8x8xbf16> to vector<8x8xf32>
    %17 = arith.addf %13, %16 : vector<8x8xf32>
    %c0_11 = arith.constant 0 : index
    %c0_12 = arith.constant 0 : index
    %18 = vector.load %arg16[%c0_11, %c0_12] : memref<8x1xf32, #tpu.memory_space<vmem>>, vector<8x1xf32>
    %cst_13 = arith.constant dense<0xFF800000> : vector<8xf32>
    %19 = vector.multi_reduction <maximumf>, %17, %cst_13 [1] : vector<8x8xf32> to vector<8xf32>
    %20 = vector.shape_cast %19 : vector<8xf32> to vector<8x1xf32>
    %21 = arith.maximumf %18, %20 : vector<8x1xf32>
    %c0_14 = arith.constant 0 : index
    %c0_15 = arith.constant 0 : index
    %22 = vector.load %arg16[%c0_14, %c0_15] : memref<8x1xf32, #tpu.memory_space<vmem>>, vector<8x1xf32>
    %23 = arith.subf %22, %21 : vector<8x1xf32>
    %24 = math.exp %23 : vector<8x1xf32>
    %25 = vector.broadcast %21 : vector<8x1xf32> to vector<8x8xf32>
    %26 = arith.subf %17, %25 : vector<8x8xf32>
    %27 = math.exp %26 : vector<8x8xf32>
    %c0_16 = arith.constant 0 : index
    %c0_17 = arith.constant 0 : index
    %28 = vector.load %arg17[%c0_16, %c0_17] : memref<8x1xf32, #tpu.memory_space<vmem>>, vector<8x1xf32>
    %29 = arith.mulf %24, %28 : vector<8x1xf32>
    %cst_18 = arith.constant dense<0.000000e+00> : vector<8xf32>
    %30 = vector.multi_reduction <add>, %27, %cst_18 [1] : vector<8x8xf32> to vector<8xf32>
    %31 = vector.shape_cast %30 : vector<8xf32> to vector<8x1xf32>
    %32 = arith.addf %29, %31 : vector<8x1xf32>
    %c0_19 = arith.constant 0 : index
    %c0_20 = arith.constant 0 : index
    %33 = vector.load %arg17[%c0_19, %c0_20] : memref<8x1xf32, #tpu.memory_space<vmem>>, vector<8x1xf32>
    tpu.vector_store %arg17[%c0_19, %c0_20], %32 {strides = array<i32>} : memref<8x1xf32, #tpu.memory_space<vmem>>, vector<8x1xf32>,
    %c0_21 = arith.constant 0 : index
    %c0_22 = arith.constant 0 : index
    %34 = vector.load %arg18[%c0_21, %c0_22] : memref<8x128xf32, #tpu.memory_space<vmem>>, vector<8x128xf32>
    %35 = vector.broadcast %24 : vector<8x1xf32> to vector<8x128xf32>
    %36 = arith.mulf %35, %34 : vector<8x128xf32>
    %37 = arith.truncf %27 : vector<8x8xf32> to vector<8x8xbf16>
    %cst_23 = arith.constant dense<0.000000e+00> : vector<8x128xf32>
    %38 = tpu.matmul %37, %11, %cst_23 {dimension_numbers = #tpu.dot_dimension_numbers<[1], [0], [0], [1], [0, 0, 1, 1], [], []>} : vector<8x8xbf16>, vector<8x128xbf16>, vector<8x128xf32> -> vector<8x128xf32>
    %39 = arith.addf %36, %38 : vector<8x128xf32>
    %c0_24 = arith.constant 0 : index
    %c0_25 = arith.constant 0 : index
    %40 = vector.load %arg18[%c0_24, %c0_25] : memref<8x128xf32, #tpu.memory_space<vmem>>, vector<8x128xf32>
    tpu.vector_store %arg18[%c0_24, %c0_25], %39 {strides = array<i32>} : memref<8x128xf32, #tpu.memory_space<vmem>>, vector<8x128xf32>,
    %c0_26 = arith.constant 0 : index
    %c0_27 = arith.constant 0 : index
    %41 = vector.load %arg16[%c0_26, %c0_27] : memref<8x1xf32, #tpu.memory_space<vmem>>, vector<8x1xf32>
    tpu.vector_store %arg16[%c0_26, %c0_27], %21 {strides = array<i32>} : memref<8x1xf32, #tpu.memory_space<vmem>>, vector<8x1xf32>,
    %c0_i32_28 = arith.constant 0 : i32
    %42 = arith.cmpi eq, %arg2, %c0_i32_28 : i32
    %43 = arith.extui %42 : i1 to i32
    %c0_i32_29 = arith.constant 0 : i32
    %44 = arith.cmpi ne, %43, %c0_i32_29 : i32
    scf.if %44 {
      %c0_30 = arith.constant 0 : index
      %c0_31 = arith.constant 0 : index
      %45 = vector.load %arg18[%c0_30, %c0_31] : memref<8x128xf32, #tpu.memory_space<vmem>>, vector<8x128xf32>
      %c0_32 = arith.constant 0 : index
      %c0_33 = arith.constant 0 : index
      %46 = vector.load %arg17[%c0_32, %c0_33] : memref<8x1xf32, #tpu.memory_space<vmem>>, vector<8x1xf32>
      %47 = tpu.reciprocal %46 {approx = true} : vector<8x1xf32> -> vector<8x1xf32>
      %48 = vector.broadcast %47 : vector<8x1xf32> to vector<8x128xf32>
      %49 = arith.mulf %45, %48 : vector<8x128xf32>
      %50 = arith.truncf %49 : vector<8x128xf32> to vector<8x128xbf16>
      %c0_34 = arith.constant 0 : index
      %c0_35 = arith.constant 0 : index
      %51 = vector.load %arg11[%c0_34, %c0_35] : memref<128x128xbf16, #tpu.memory_space<vmem>>, vector<128x128xbf16>
      %cst_36 = arith.constant dense<0.000000e+00> : vector<8x128xf32>
      %52 = tpu.matmul %50, %51, %cst_36 {dimension_numbers = #tpu.dot_dimension_numbers<[1], [0], [0], [1], [0, 0, 1, 1], [], []>} : vector<8x128xbf16>, vector<128x128xbf16>, vector<8x128xf32> -> vector<8x128xf32>
      %c0_37 = arith.constant 0 : index
      %c0_38 = arith.constant 0 : index
      %c0_39 = arith.constant 0 : index
      %53 = vector.load %arg4[%c0_37, %c0_38, %c0_39] : memref<1x8x128xf32, #tpu.memory_space<vmem>>, vector<1x8x128xf32>
      %54 = vector.shape_cast %53 : vector<1x8x128xf32> to vector<8x128xf32>
      %55 = arith.addf %54, %52 : vector<8x128xf32>
      %c0_40 = arith.constant 0 : index
      %c0_41 = arith.constant 0 : index
      %c0_42 = arith.constant 0 : index
      %56 = vector.load %arg12[%c0_40, %c0_41, %c0_42] : memref<1x8x128xf32, #tpu.memory_space<vmem>>, vector<1x8x128xf32>
      %57 = vector.shape_cast %56 : vector<1x8x128xf32> to vector<8x128xf32>
      %58 = vector.shape_cast %55 : vector<8x128xf32> to vector<1x8x128xf32>
      tpu.vector_store %arg12[%c0_40, %c0_41, %c0_42], %58 {strides = array<i32>} : memref<1x8x128xf32, #tpu.memory_space<vmem>>, vector<1x8x128xf32>,
    } else {
    }
    return
  }
  func.func @transform_0(%arg0: i32, %arg1: i32, %arg2: i32) -> (i32, i32, i32) {
    %c0_i32 = arith.constant 0 : i32
    %c0_i32_0 = arith.constant 0 : i32
    return %c0_i32, %arg1, %arg2 : i32, i32, i32
  }
  func.func @transform_1(%arg0: i32, %arg1: i32, %arg2: i32) -> (i32, i32, i32) {
    %c0_i32 = arith.constant 0 : i32
    %c0_i32_0 = arith.constant 0 : i32
    return %arg0, %arg1, %c0_i32 : i32, i32, i32
  }
  func.func @transform_2(%arg0: i32, %arg1: i32, %arg2: i32) -> (i32, i32, i32) {
    %c1_i32 = arith.constant 1 : i32
    %0 = arith.minsi %arg1, %c1_i32 : i32
    %c1_i32_0 = arith.constant 1 : i32
    %1 = arith.subi %c1_i32_0, %0 : i32
    %2 = arith.muli %arg2, %1 : i32
    %c0_i32 = arith.constant 0 : i32
    %c0_i32_1 = arith.constant 0 : i32
    return %arg0, %2, %c0_i32 : i32, i32, i32
  }
  func.func @transform_3(%arg0: i32, %arg1: i32, %arg2: i32) -> (i32, i32, i32) {
    %c0_i32 = arith.constant 0 : i32
    %c0_i32_0 = arith.constant 0 : i32
    return %arg0, %arg1, %c0_i32 : i32, i32, i32
  }
  func.func @transform_4(%arg0: i32, %arg1: i32, %arg2: i32) -> (i32, i32, i32) {
    %c1_i32 = arith.constant 1 : i32
    %0 = arith.minsi %arg1, %c1_i32 : i32
    %c1_i32_0 = arith.constant 1 : i32
    %1 = arith.subi %c1_i32_0, %0 : i32
    %2 = arith.muli %arg2, %1 : i32
    %c0_i32 = arith.constant 0 : i32
    %c0_i32_1 = arith.constant 0 : i32
    return %arg0, %2, %c0_i32 : i32, i32, i32
  }
  func.func @transform_5(%arg0: i32, %arg1: i32, %arg2: i32) -> (i32, i32) {
    %c0_i32 = arith.constant 0 : i32
    %c0_i32_0 = arith.constant 0 : i32
    %c0_i32_1 = arith.constant 0 : i32
    return %c0_i32, %c0_i32_0 : i32, i32
  }
  func.func @transform_6(%arg0: i32, %arg1: i32, %arg2: i32) -> (i32, i32) {
    %c0_i32 = arith.constant 0 : i32
    %c0_i32_0 = arith.constant 0 : i32
    %c0_i32_1 = arith.constant 0 : i32
    return %c0_i32, %c0_i32_0 : i32, i32
  }
  func.func @transform_7(%arg0: i32, %arg1: i32, %arg2: i32) -> (i32, i32) {
    %c0_i32 = arith.constant 0 : i32
    %c0_i32_0 = arith.constant 0 : i32
    %c0_i32_1 = arith.constant 0 : i32
    return %c0_i32, %c0_i32_0 : i32, i32
  }
  func.func @transform_8(%arg0: i32, %arg1: i32, %arg2: i32) -> (i32, i32) {
    %c0_i32 = arith.constant 0 : i32
    %c0_i32_0 = arith.constant 0 : i32
    %c0_i32_1 = arith.constant 0 : i32
    return %c0_i32, %c0_i32_0 : i32, i32
  }
  func.func @transform_9(%arg0: i32, %arg1: i32, %arg2: i32) -> (i32, i32, i32) {
    %c0_i32 = arith.constant 0 : i32
    %c0_i32_0 = arith.constant 0 : i32
    return %arg0, %arg1, %c0_i32 : i32, i32, i32
  }
}

</mosaic_0001>

<bundles_post_ra>
// kernel: tpu_custom_call.1
= control target key start
LH: loop header
LB: loop body
LE: loop exit
PB: predicated region body
PF: predicated region fallthrough
CT: control target
= control target key end

     0   :  { %s2551_s0 = inlined_call_operand.hbm [shape: bf16[1,8,8], index: 0, kind: input, shape index: {}]   ;;  %s2552_s1 = inlined_call_operand.hbm [shape: f32[2,8,128], index: 1, kind: input, shape index: {}]   ;;  %s2553_s2 = inlined_call_operand.hbm [shape: bf16[2,8,128], index: 2, kind: input, shape index: {}]   ;;  %s2554_s3 = inlined_call_operand.hbm [shape: bf16[2,8,128], index: 3, kind: input, shape index: {}]   ;;  %s2555_s4 = inlined_call_operand.hbm [shape: bf16[2,8,128], index: 4, kind: input, shape index: {}]   ;;  %s2556_s5 = inlined_call_operand.hbm [shape: bf16[128,128], index: 5, kind: input, shape index: {}]   ;;  %s2557_s6 = inlined_call_operand.hbm [shape: bf16[128,128], index: 6, kind: input, shape index: {}]   ;;  %s2558_s7 = inlined_call_operand.hbm [shape: bf16[128,128], index: 7, kind: input, shape index: {}]   ;;  %s2559_s8 = inlined_call_operand.hbm [shape: bf16[128,128], index: 8, kind: input, shape index: {}]   ;;  %s2560_s9 = inlined_call_operand.hbm [shape: f32[2,8,128], index: 9, kind: output, shape index: {}]  }
   0x1   :  { %2577 = sst [smem:[#allocation36_spill]] %s2551_s0 }
   0x2   :  { %2578 = sst [smem:[#allocation37_spill]] %s2552_s1 }
   0x3   :  { %2579 = sst [smem:[#allocation38_spill]] %s2554_s3 }
   0x4   :  { %2580 = sst [smem:[#allocation39_spill]] %s2556_s5 }
   0x5   :  { %2581 = sst [smem:[#allocation40_spill]] %s2558_s7 }
   0x6   :  { %2582 = sst [smem:[#allocation41_spill]] %s2560_s9 }
   0x7   :  { %14 = vsyncpa [#allocation9], 0 }
   0x8   :  { %15 = vsyncpa [#allocation12], 0 }
   0x9   :  { %17 = vsyncpa [#allocation12 + $0x1], 0 }
   0xa   :  { %18 = vsyncpa [#allocation15], 0 }
   0xb   :  { %20 = vsyncpa [#allocation15 + $0x1], 0 }
   0xc   :  { %21 = vsyncpa [#allocation18], 0 }
   0xd   :  { %22 = vsyncpa [#allocation21], 0 }
   0xe   :  { %23 = vsyncpa [#allocation10], 0 }
   0xf   :  { %25 = vsyncpa [#allocation10 + $0x1], 0  ;;  %s2191_s30 = smov 0   ;;  %s2193_s10 = smov 0  }
  0x10   :  { %s2195_s11 = smov 0   ;;  %s2197_s12 = smov 0  }
  0x11   :  { %s2199_s13 = smov 0   ;;  %s2201_s14 = smov 0  }
  0x12 LB: > { %2583 = sst [smem:[#allocation30_spill]] %s2103_s30  ;;  %s2125_s15 = smov [#allocation17]   ;;  %s2123_s14 = sphi %s2201_s14, %s31_s14   ;;  %s2119_s13 = sphi %s2199_s13, %s2626_s13   ;;  %s2115_s12 = sphi %s2197_s12, %s2625_s12   ;;  %s2111_s11 = sphi %s2195_s11, %s2624_s11   ;;  %s2107_s10 = sphi %s2193_s10, %s2628_s10   ;;  %s2103_s30 = sphi %s2191_s30, %s2627_s30  }
  0x13   : > { %2584 = sst [smem:[#allocation31_spill]] %s2111_s11  ;;  %s349_s16 = sshll.u32 %s2125_s15, 4  ;;  %s350_s16 = int_to_ptr.vmem [resolvable:$true] %s349_s16 }
  0x14   : > { %2585 = sst [smem:[#allocation32_spill]] %s2115_s12  ;;  %s2222_s17 = sadd.s32 4294967295, %s2123_s14  }
  0x15   : > { %2586 = sst [smem:[#allocation33_spill]] %s2119_s13  ;;  %p1416_p0 = scmp.ge.s32.totalorder %s2123_s14, 1 }
  0x16   : > { %p2569_p1 = scmp.eq.s32.totalorder %s2222_s17, 0  ;;  %p323_p2 = scmp.lt.s32.totalorder %s2123_s14, 3 }
  0x17   : > { %s2126_s19 = smov [#allocation20]   ;;  %s1796_s23 = scalar_lea.vmem %s350_s16, 1024 }
  0x18   : > { %p2227_p3 = pnand %p1416_p0, %p323_p2  ;;  %s375_s20 = sshll.u32 %s2126_s19, 4  ;;  %s376_s20 = int_to_ptr.vmem [resolvable:$true] %s375_s20 }
  0x19   : > { %p1797_p8 = scmp.ne.s32.totalorder %s350_s16, %s1796_s23  ;;  %p1804_p11 = scmp.lt.s32.totalorder %s350_s16, %s350_s16 }
  0x1a   : > { %s2587_s18 = scalar_select %p2227_p3, 1, 0 }
  0x1b   : > { %p1641_p5 = pneg %p2227_p3  ;;  %p1805_p12 = scmp.lt.s32.totalorder %s1796_s23, %s1796_s23 }
  0x1d   : > { %p2236_p6 = pnand %p1641_p5, %p2569_p1  ;;  %p1806_p13 = por %p1805_p12, %p1804_p11 }
  0x1f   : > { %p2242_p7 = pneg %p2236_p6 }
  0x21   : > { %p1799_p9 = pnand %p1797_p8, %p2242_p7 }
  0x23   : > { %p1800_p10 = pneg %p1799_p9 }
  0x25   : > { %p1807_p0 = pnand %p1806_p13, %p1800_p10 }
  0x27   : > { %1810 = shalt.err (!%p1807_p0)
}
  0x28   : > { %s2561_s24 = smov 64   ;;  %s2563_s25 = smov 4  }
  0x29   : > { %s2590_s5 = sld [smem:[#allocation39_spill]]  ;;  %s1822_s28 = scalar_lea.vmem %s376_s20, 1024 }
  0x2a   : > { %p1823_p2 = scmp.ne.s32.totalorder %s376_s20, %s1822_s28  ;;  %p1830_p9 = scmp.lt.s32.totalorder %s376_s20, %s376_s20 }
  0x2b   : > { %p1831_p10 = scmp.lt.s32.totalorder %s1822_s28, %s1822_s28 }
  0x2c   : > { %p1825_p5 = pnand %p1823_p2, %p2242_p7 }
  0x2d   : > { %p1832_p11 = por %p1831_p10, %p1830_p9 }
  0x2e   : > { %p1826_p8 = pneg %p1825_p5 }
  0x2f   : > { %1647 = dma.hbm_to_vmem [thread:$0]  (!%p2236_p6), %s2590_s5, 1024, %s350_s16, [#allocation18], %s2561_s24, %s2561_s24, %s2563_s25  }
  0x30   : > { %p1833_p12 = pnand %p1832_p11, %p1826_p8 }
  0x32   : > { %1836 = shalt.err (!%p1833_p12)
}
  0x33   : > { %s2591_s7 = sld [smem:[#allocation40_spill]]  ;;  %s1415_s16 = sadd.s32 4294967294, %s2123_s14  }
  0x34   : > { %s50_s19 = sadd.s32 1, %s2119_s13  ;;  %s87_s23 = sadd.s32 1, %s2111_s11 }
  0x35   : > { %p52_p13 = scmp.ge.s32.totalorder %s50_s19, 2  ;;  %p94_p0 = scmp.ne.s32.totalorder %s2111_s11, %s2107_s10 }
  0x36   : > { %p95_p2 = scmp.eq.s32.totalorder %s2123_s14, 0  ;;  %p100_p8 = scmp.ne.s32.totalorder %s2107_s10, %s2103_s30 }
  0x37   : > { %s2630_s19 = smov (%p52_p13, %s50_s19), 0  ;;  %p310_p9 = scmp.eq.s32.totalorder %s2222_s17, 1 }
  0x38   : > { %2592 = sst [smem:[#allocation34_spill]] %s2630_s19  ;;  %p2274_p5 = por %p95_p2, %p94_p0 }
  0x39   : > { %1653 = dma.hbm_to_vmem [thread:$0]  (!%p2236_p6), %s2591_s7, 1024, %s376_s20, [#allocation21], %s2561_s24, %s2561_s24, %s2563_s25  }
  0x3a   : > { %s82_s20 = ssub.s32 %s2119_s13, %s2630_s19  ;;  %p2285_p11 = por %p2569_p1, %p100_p8 }
  0x3b   : > { %p85_p10 = scmp.eq.s32.totalorder %s82_s20, 0  ;;  %p2289_p12 = por %p310_p9, %p94_p0 }
  0x3c   : > { %s2594_s27 = scalar_select %p2285_p11, 1, 0 }
  0x3d   : > { %s2595_s28 = scalar_select %p2289_p12, 1, 0 }
  0x3e   : > { %p316_p13 = scmp.eq.s32.totalorder %s1415_s16, 1  ;;  %p1679_p4 = scmp.lt.s32.totalorder %s2123_s14, 2 }
  0x3f   : > { %s2294_s29 = scalar_select %p85_p10, %s2111_s11, %s87_s23  }
  0x40   : > { %p2296_p2 = por %p316_p13, %p100_p8  ;;  %s404_s24 = sand.u32 1, %s2111_s11  }
  0x41   : > { %2596 = sst [smem:[#allocation35_spill]] %s2294_s29  ;;  %s1423_s25 = sshll.u32 %s404_s24, 3 }
  0x42   : > { %s2597_s15 = scalar_select %p2296_p2, 1, 0 }
  0x43   : > { %s1424_s5 = sshll.u32 %s2119_s13, 7  ;;  %s2598_s1 = sld [smem:[#allocation37_spill]] }
  0x44   : > { %s406_s9 = scalar_lea.vmem [#allocation11], %s1423_s25  ;;  %p2309_p0 = pnand %p1679_p4, %p2274_p5 }
  0x45   : > { %s414_s12 = sshll.u32 %s406_s9, 4  ;;  %s2313_s23 = sshll.u32 %s404_s24, 2  ;;  %s415_s12 = int_to_ptr.vmem [resolvable:$true] %s414_s12 }
  0x46   : > { %s2599_s16 = scalar_select %p2309_p0, 1, 0 }
  0x47   : > { %s2316_s20 = sshll.u32 %s2119_s13, 6  ;;  %s2600_s29 = sand.u32 1, %s2123_s14  }
  0x48   : > { %s2320_s11 = scalar_lea.sflag [#allocation12], %s2600_s29  ;;  %p2571_p8 = pneg %p2309_p0 }
  0x49   : > { %s412_s30 = scalar_lea.hbm %s2598_s1, %s1424_s5  ;;  %s1850_s5 = scalar_lea.vmem %s415_s12, 128 }
  0x4a   : > { %p1851_p9 = scmp.ne.s32.totalorder %s415_s12, %s1850_s5  ;;  %s2129_s7 = smov [#allocation11]  }
  0x4b   : > { %s1855_s9 = sshll.u32 %s2129_s7, 4  ;;  %s1856_s9 = int_to_ptr.vmem [resolvable:$false] %s1855_s9 }
  0x4c   : > { %p1853_p10 = pnand %p1851_p9, %p2571_p8  ;;  %s1857_s25 = scalar_lea.vmem %s1856_s9, 256 }
  0x4d   : > { %p1858_p5 = scmp.lt.s32.totalorder %s415_s12, %s1856_s9  ;;  %p1859_p13 = scmp.lt.s32.totalorder %s1857_s25, %s1850_s5 }
  0x4e   : > { %p1854_p4 = pneg %p1853_p10 }
  0x4f   : > { %p1860_p1 = por %p1859_p13, %p1858_p5 }
  0x51   : > { %p1861_p2 = pnand %p1860_p1, %p1854_p4 }
  0x53   : > { %1864 = shalt.err (!%p1861_p2)
}
  0x54   : > { %1660 = dma.hbm_to_vmem [thread:$0]  (!%p2309_p0), %s412_s30, 128, %s415_s12, %s2320_s11  }
  0x55   : > { %s2601_s3 = sld [smem:[#allocation38_spill]]  ;;  %s448_s29 = scalar_lea.vmem [#allocation14], %s2313_s23 }
  0x56   : > { %s456_s7 = sshll.u32 %s448_s29, 4  ;;  %s2602_s9 = sand.u32 1, %s2123_s14   ;;  %s457_s7 = int_to_ptr.vmem [resolvable:$true] %s456_s7 }
  0x57   : > { %s2337_s5 = scalar_lea.sflag [#allocation15], %s2602_s9  ;;  %s1878_s25 = scalar_lea.vmem %s457_s7, 64 }
  0x58   : > { %p1879_p1 = scmp.ne.s32.totalorder %s457_s7, %s1878_s25  ;;  %s2130_s1 = smov [#allocation14]  }
  0x59   : > { %s1883_s13 = sshll.u32 %s2130_s1, 4  ;;  %s1884_s13 = int_to_ptr.vmem [resolvable:$false] %s1883_s13 }
  0x5a   : > { %p1881_p2 = pnand %p1879_p1, %p2571_p8  ;;  %s1885_s30 = scalar_lea.vmem %s1884_s13, 128 }
  0x5b   : > { %s454_s26 = scalar_lea.hbm %s2601_s3, %s2316_s20  ;;  %p1886_p10 = scmp.lt.s32.totalorder %s457_s7, %s1884_s13 }
  0x5c   : > { %p1882_p9 = pneg %p1881_p2  ;;  %p1887_p4 = scmp.lt.s32.totalorder %s1885_s30, %s1878_s25 }
  0x5e   : > { %p1888_p5 = por %p1887_p4, %p1886_p10 }
  0x60   : > { %p1889_p13 = pnand %p1888_p5, %p1882_p9 }
  0x62   : > { %1892 = shalt.err (!%p1889_p13)
}
  0x63   : > { %1666 = dma.hbm_to_vmem [thread:$0]  (!%p2309_p0), %s454_s26, 64, %s457_s7, %s2337_s5  }
  0x64   : > { %s2131_s12 = smov [#allocation8]   ;;  %s2132_s19 = smov [#allocation19]  }
  0x65   : > { %s339_s24 = sshll.u32 %s2131_s12, 4  ;;  %s362_s29 = sshll.u32 %s2132_s19, 4  ;;  %s340_s24 = int_to_ptr.vmem [resolvable:$true] %s339_s24  ;;  %s363_s29 = int_to_ptr.vmem [resolvable:$true] %s362_s29 }
  0x66   : > { %s1904_s9 = scalar_lea.vmem %s340_s24, 64  ;;  %p1912_p12 = scmp.lt.s32.totalorder %s340_s24, %s340_s24 }
  0x67   : > { %p1905_p1 = scmp.ne.s32.totalorder %s340_s24, %s1904_s9  ;;  %p1913_p10 = scmp.lt.s32.totalorder %s1904_s9, %s1904_s9 }
  0x69   : > { %p1907_p2 = pnand %p1905_p1, %p2242_p7  ;;  %p1914_p9 = por %p1913_p10, %p1912_p12 }
  0x6b   : > { %p1908_p8 = pneg %p1907_p2 }
  0x6d   : > { %p1915_p4 = pnand %p1914_p9, %p1908_p8 }
  0x6f   : > { %1918 = shalt.err (!%p1915_p4)
}
  0x70   : > { %s2603_s0 = sld [smem:[#allocation36_spill]]  ;;  %s1930_s26 = scalar_lea.vmem %s363_s29, 1024 }
  0x71   : > { %p1931_p5 = scmp.ne.s32.totalorder %s363_s29, %s1930_s26  ;;  %p1938_p3 = scmp.lt.s32.totalorder %s363_s29, %s363_s29 }
  0x72   : > { %p1939_p1 = scmp.lt.s32.totalorder %s1930_s26, %s1930_s26 }
  0x73   : > { %p1933_p13 = pnand %p1931_p5, %p2242_p7 }
  0x74   : > { %p1940_p2 = por %p1939_p1, %p1938_p3 }
  0x75   : > { %p1934_p11 = pneg %p1933_p13 }
  0x76   : > { %1644 = dma.hbm_to_vmem [thread:$0]  (!%p2236_p6), %s2603_s0, 64, %s340_s24, [#allocation9]  }
  0x77   : > { %p1941_p0 = pnand %p1940_p2, %p1934_p11 }
  0x79   : > { %1944 = shalt.err (!%p1941_p0)
}
  0x7a   : > { %s2604_s7 = smov 4   ;;  %s2605_s25 = smov 64  }
  0x7b   : > { %1650 = dma.hbm_to_vmem [thread:$0]  (!%p2236_p6), %s2557_s6, 1024, %s363_s29, [#allocation18], %s2605_s25, %s2605_s25, %s2604_s7  }
  0x7c   : > { %s2133_s24 = smov [#allocation22]   ;;  %s435_s13 = scalar_lea.hbm %s2553_s2, %s2316_s20 }
  0x7d   : > { %s388_s19 = sshll.u32 %s2133_s24, 4  ;;  %s425_s26 = scalar_lea.vmem [#allocation13], %s2313_s23  ;;  %s389_s19 = int_to_ptr.vmem [resolvable:$true] %s388_s19 }
  0x7e   : > { %s437_s0 = sshll.u32 %s425_s26, 4  ;;  %s1956_s3 = scalar_lea.vmem %s389_s19, 1024  ;;  %s438_s0 = int_to_ptr.vmem [resolvable:$true] %s437_s0 }
  0x7f   : > { %p1957_p3 = scmp.ne.s32.totalorder %s389_s19, %s1956_s3  ;;  %p1964_p0 = scmp.lt.s32.totalorder %s389_s19, %s389_s19 }
  0x80   : > { %p1965_p8 = scmp.lt.s32.totalorder %s1956_s3, %s1956_s3 }
  0x81   : > { %p1959_p11 = pnand %p1957_p3, %p2242_p7 }
  0x82   : > { %p1966_p10 = por %p1965_p8, %p1964_p0 }
  0x83   : > { %p1960_p12 = pneg %p1959_p11 }
  0x85   : > { %p1967_p9 = pnand %p1966_p10, %p1960_p12 }
  0x87   : > { %1970 = shalt.err (!%p1967_p9)
}
  0x88   : > { %1656 = dma.hbm_to_vmem [thread:$0]  (!%p2236_p6), %s2559_s8, 1024, %s389_s19, [#allocation21], %s2605_s25, %s2605_s25, %s2604_s7  }
  0x89   : > { %s1984_s12 = scalar_lea.vmem %s438_s0, 64  ;;  %p2606_p7 = scmp.ne.s32.totalorder %s2599_s16, 0 }
  0x8a   : > { %p1985_p4 = scmp.ne.s32.totalorder %s438_s0, %s1984_s12  ;;  %s2134_s3 = smov [#allocation13]  }
  0x8b   : > { %p2607_p5 = pneg %p2606_p7  ;;  %s1989_s22 = sshll.u32 %s2134_s3, 4  ;;  %s1990_s22 = int_to_ptr.vmem [resolvable:$false] %s1989_s22 }
  0x8c   : > { %s1991_s24 = scalar_lea.vmem %s1990_s22, 128  ;;  %p1992_p2 = scmp.lt.s32.totalorder %s438_s0, %s1990_s22 }
  0x8d   : > { %p1987_p13 = pnand %p1985_p4, %p2607_p5  ;;  %p1993_p3 = scmp.lt.s32.totalorder %s1991_s24, %s1984_s12 }
  0x8f   : > { %p1988_p1 = pneg %p1987_p13  ;;  %p1994_p11 = por %p1993_p3, %p1992_p2 }
  0x91   : > { %p1995_p12 = pnand %p1994_p11, %p1988_p1 }
  0x93   : > { %1998 = shalt.err (!%p1995_p12)
}
  0x94   : > { %1663 = dma.hbm_to_vmem [thread:$0]  (!%p2606_p7), %s435_s13, 64, %s438_s0, %s2320_s11  }
  0x95   : > { %s477_s9 = scalar_lea.hbm %s2555_s4, %s2316_s20  ;;  %s467_s1 = scalar_lea.vmem [#allocation16], %s2313_s23 }
  0x96   : > { %s479_s26 = sshll.u32 %s467_s1, 4  ;;  %p2608_p0 = pmov %p2607_p5  ;;  %s480_s26 = int_to_ptr.vmem [resolvable:$true] %s479_s26 }
  0x97   : > { %s2012_s29 = scalar_lea.vmem %s480_s26, 64  ;;  %s2135_s30 = smov [#allocation16]  }
  0x98   : > { %p2013_p6 = scmp.ne.s32.totalorder %s480_s26, %s2012_s29  ;;  %s2017_s12 = sshll.u32 %s2135_s30, 4  ;;  %s2018_s12 = int_to_ptr.vmem [resolvable:$false] %s2017_s12 }
  0x99   : > { %s2019_s3 = scalar_lea.vmem %s2018_s12, 128  ;;  %p2020_p9 = scmp.lt.s32.totalorder %s480_s26, %s2018_s12 }
  0x9a   : > { %p2015_p8 = pnand %p2013_p6, %p2608_p0  ;;  %p2021_p4 = scmp.lt.s32.totalorder %s2019_s3, %s2012_s29 }
  0x9c   : > { %p2016_p10 = pneg %p2015_p8  ;;  %p2022_p5 = por %p2021_p4, %p2020_p9 }
  0x9e   : > { %p2023_p13 = pnand %p2022_p5, %p2016_p10 }
  0xa0   : > { %2026 = shalt.err (!%p2023_p13)
}
  0xa1   : > { %1669 = dma.hbm_to_vmem [thread:$0]  (!%p2606_p7), %s477_s9, 64, %s480_s26, %s2337_s5  }
  0xa2   : > { %p2609_p1 = scmp.ne.s32.totalorder %s2587_s18, 0 }
  0xa3   : > { %p2610_p2 = scmp.eq.s32.totalorder (!%p2609_p1), %s2222_s17, 0 }
  0xa4   : > { %488 = sbr.rel (%p2609_p1) target bundleno = 1406 (0x57e), region = 56 }
  0xa9   : > { %2078 = dma.done.wait (%p2610_p2), [#allocation9], 64   ;;  %p2611_p3 = pmov %p2610_p2 }
  0xaa   : > { %s494_s0 = sand.u32 1, %s2222_s17   ;;  %s2407_s11 = sand.u32 1, %s2107_s10  }
  0xab   : > { %2080 = vsyncadd (%p2611_p3), [#allocation9], 4294967232  ;;  %s1433_s20 = sshll.u32 %s2407_s11, 3  ;;  %s495_s16 = scalar_lea.sflag [#allocation12], %s494_s0 }
  0xac   : > { %s2412_s23 = scalar_lea.vmem [#allocation11], %s1433_s20  ;;  %p2612_p7 = scmp.ne.s32.totalorder %s2594_s27, 0 }
  0xae   : > { %2082 = dma.done.wait (%p2612_p7), %s495_s16, 192  }
  0xaf   : > { %2084 = vsyncadd (%p2612_p7), %s495_s16, 4294967104  ;;  %s2419_s18 = sshll.u32 %s2407_s11, 2  ;;  %s513_s13 = scalar_lea.sflag [#allocation15], %s494_s0 }
  0xb0   : > { %s507_s5 = scalar_lea.vmem [#allocation13], %s2419_s18  ;;  %s516_s22 = scalar_lea.vmem [#allocation14], %s2419_s18 }
  0xb1   : > { %2086 = dma.done.wait (%p2612_p7), %s513_s13, 128  }
  0xb2   : > { %2088 = vsyncadd (%p2612_p7), %s513_s13, 4294967168  ;;  %s525_s24 = scalar_lea.vmem [#allocation16], %s2419_s18  ;;  %p2613_p11 = pmov %p2610_p2 }
  0xb3   : > { %p2614_p12 = pmov %p2610_p2 }
  0xb4   : > { %2090 = dma.done.wait (%p2613_p11), [#allocation18], 2048  }
  0xb5   : > { %2092 = vsyncadd (%p2614_p12), [#allocation18], 4294965248  ;;  %p2615_p6 = pmov %p2610_p2 }
  0xb6   : > { %p2616_p0 = pmov %p2610_p2 }
  0xb7   : > { %2094 = dma.done.wait (%p2615_p6), [#allocation21], 2048  }
  0xb8   : > { %2096 = vsyncadd (%p2616_p0), [#allocation21], 4294965248  ;;  %v2136_v0 = vmov 0.0   ;;  %vm2137_vm0 = vmmov 0   ;;  %v1747_v1 = vld [vmem:[#allocation19 + $0x38] sm:$0xff]   ;;  %v1749_v3 = vld [vmem:[#allocation19 + $0x30] sm:$0xff]  }
  0xb9   : > { %1539 = vmatprep.subr.bf16.mxu1 %v2136_v0  ;;  %1519 = vmatprep.subr.bf16.mxu0 %v2136_v0  ;;  %v1748_v2 = vld [vmem:[#allocation17 + $0x38] sm:$0xff]   ;;  %v1750_v4 = vld [vmem:[#allocation17 + $0x30] sm:$0xff]   ;;  %v1751_v5 = vld [vmem:[#allocation19 + $0x28] sm:$0xff]   ;;  %vm1022_vm1 = vcmask 1043456   ;;  %vm711_vm2 = vcmask 7168   ;;  %v2138_v47 = vmov -inf  }
  0xba   : > { %1555 = vmatprep.mubr.msk.bf16.mxu1 %vm2137_vm0, %v2136_v0  ;;  %1535 = vmatprep.mubr.msk.bf16.mxu0 %vm2137_vm0, %v2136_v0  ;;  %v1752_v6 = vld [vmem:[#allocation17 + $0x28] sm:$0xff]   ;;  %v1753_v7 = vld [vmem:[#allocation19 + $0x20] sm:$0xff]   ;;  %v1755_v9 = vld [vmem:[#allocation19 + $0x18] sm:$0xff]   ;;  %712 = vst.msk [vmem:[#allocation5] sm:$0xff] %vm711_vm2, %v2138_v47  ;;  %vm987_vm3 = vcmask 64512   ;;  %v2139_v56 = vmov 0  }
  0xbb   : > { %1540 = vmatpush3.bf16.msra.mxu1 %v1747_v1  ;;  %1520 = vmatpush3.bf16.msra.mxu0 %v1748_v2  ;;  %v1754_v8 = vld [vmem:[#allocation17 + $0x20] sm:$0xff]   ;;  %v1756_v10 = vld [vmem:[#allocation17 + $0x18] sm:$0xff]   ;;  %v1757_v11 = vld [vmem:[#allocation19 + $0x10] sm:$0xff]   ;;  %713 = vst.msk [vmem:[#allocation6] sm:$0xff] %vm711_vm2, %v2136_v0  ;;  %s2617_s17 = sld [smem:[#allocation32_spill]]  ;;  %s590_s21 = scalar_lea.vmem [#allocation23], %s1433_s20 }
  0xbc   : > { %1541 = vmatprep.subr.bf16.mxu1 %v2136_v0  ;;  %1521 = vmatprep.subr.bf16.mxu0 %v2136_v0  ;;  %v1758_v12 = vld [vmem:[#allocation17 + $0x10] sm:$0xff]   ;;  %v1759_v13 = vld [vmem:[#allocation19 + $0x8] sm:$0xff]   ;;  %v1761_v15 = vld [vmem:[#allocation19] sm:$0xff]   ;;  %s1204_s7 = sshll.u32 %s590_s21, 4  ;;  %s2618_s9 = sld [smem:[#allocation41_spill]]  ;;  %s2505_s7 = int_to_ptr.vmem [resolvable:$true] %s1204_s7 }
  0xbd   : > { %v1760_v14 = vld [vmem:[#allocation17 + $0x8] sm:$0xff]   ;;  %v1762_v16 = vld [vmem:[#allocation17] sm:$0xff]   ;;  %v719_v17 = vld [vmem:[%s525_s24] sm:$0xf]  ;;  %1745 = vset.pattern.permute.xlu0 %v2139_v56  ;;  %1746 = vset.pattern.permute.xlu1 %v2139_v56  ;;  %s1190_s26 = scalar_lea.sflag [#allocation10], %s2407_s11  ;;  %s2027_s29 = scalar_lea.vmem %s2505_s7, 128 }
  0xbe   : > { %v604_v18 = vld [vmem:[%s516_s22] sm:$0xf]  ;;  %v1763_v19 = vld [vmem:[#allocation20 + $0x38] sm:$0xff]   ;;  %v1765_v21 = vld [vmem:[#allocation20 + $0x28] sm:$0xff]   ;;  %p2028_p8 = scmp.ne.s32.totalorder %s2505_s7, %s2027_s29  ;;  %p2619_p10 = scmp.ne.s32.totalorder %s2595_s28, 0 }
  0xbf   : > { %1542 = vmatpush3.bf16.msra.mxu1 %v1749_v3  ;;  %1522 = vmatpush3.bf16.msra.mxu0 %v1750_v4  ;;  %v1764_v20 = vld [vmem:[#allocation20 + $0x30] sm:$0xff]   ;;  %v1766_v22 = vld [vmem:[#allocation20 + $0x20] sm:$0xff]   ;;  %v1767_v23 = vld [vmem:[#allocation20 + $0x18] sm:$0xff]   ;;  %s2140_s30 = smov [#allocation23]  }
  0xc0   : > { %1543 = vmatprep.subr.bf16.mxu1 %v2136_v0  ;;  %1523 = vmatprep.subr.bf16.mxu0 %v2136_v0  ;;  %v1768_v24 = vld [vmem:[#allocation20 + $0x10] sm:$0xff]   ;;  %v1769_v25 = vld [vmem:[#allocation20 + $0x8] sm:$0xff]   ;;  %v1770_v26 = vld [vmem:[#allocation20] sm:$0xff]   ;;  %p2029_p9 = pnand %p2028_p8, %p2619_p10  ;;  %s2031_s12 = sshll.u32 %s2140_s30, 4  ;;  %s2032_s12 = int_to_ptr.vmem [resolvable:$false] %s2031_s12 }
  0xc1   : > { %v828_v27 = vld [vmem:[%s507_s5] sm:$0xf]  ;;  %v944_v48 = vld [vmem:[#allocation8] sm:$0xf]  ;;  %s1476_s27 = sshll.u32 %s2617_s17, 7  ;;  %s2033_s3 = scalar_lea.vmem %s2032_s12, 256 }
  0xc2   : > { %v945_v49 = vunpack.c.l.bf16 %v944_v48  ;;  %v986_v57 = vld [vmem:[#allocation5] sm:$0xff]  ;;  %s2503_s1 = scalar_lea.hbm %s2618_s9, %s1476_s27  ;;  %p2030_p4 = pneg %p2029_p9 }
  0xc3   : > { %1544 = vmatpush3.bf16.msra.mxu1 %v1751_v5  ;;  %1524 = vmatpush3.bf16.msra.mxu0 %v1752_v6  ;;  %v1771_v6 = vld [vmem:[#allocation22 + $0x38] sm:$0xff]   ;;  %p2034_p5 = scmp.lt.s32.totalorder %s2505_s7, %s2032_s12  ;;  %p2035_p13 = scmp.lt.s32.totalorder %s2033_s3, %s2027_s29 }
  0xc4   : > { %1545 = vmatprep.subr.bf16.mxu1 %v2136_v0  ;;  %1525 = vmatprep.subr.bf16.mxu0 %v2136_v0 }
  0xc5   : > { %p2036_p1 = por %p2035_p13, %p2034_p5 }
  0xc7   : > { %1546 = vmatpush3.bf16.msra.mxu1 %v1753_v7  ;;  %1526 = vmatpush3.bf16.msra.mxu0 %v1754_v8  ;;  %v1772_v7 = vld [vmem:[#allocation22 + $0x30] sm:$0xff]   ;;  %v1773_v8 = vld [vmem:[#allocation22 + $0x28] sm:$0xff]   ;;  %p2037_p2 = pnand %p2036_p1, %p2030_p4 }
  0xc8   : > { %1547 = vmatprep.subr.bf16.mxu1 %v2136_v0  ;;  %1527 = vmatprep.subr.bf16.mxu0 %v2136_v0 }
  0xcb   : > { %1548 = vmatpush3.bf16.msra.mxu1 %v1755_v9  ;;  %1528 = vmatpush3.bf16.msra.mxu0 %v1756_v10  ;;  %v1774_v9 = vld [vmem:[#allocation22 + $0x20] sm:$0xff]   ;;  %v1775_v10 = vld [vmem:[#allocation22 + $0x18] sm:$0xff]  }
  0xcc   : > { %1549 = vmatprep.subr.bf16.mxu1 %v2136_v0  ;;  %1529 = vmatprep.subr.bf16.mxu0 %v2136_v0 }
  0xcf   : > { %1550 = vmatpush3.bf16.msra.mxu1 %v1757_v11  ;;  %1530 = vmatpush3.bf16.msra.mxu0 %v1758_v12  ;;  %v1776_v11 = vld [vmem:[#allocation22 + $0x10] sm:$0xff]   ;;  %v1777_v12 = vld [vmem:[#allocation22 + $0x8] sm:$0xff]  }
  0xd0   : > { %1551 = vmatprep.subr.bf16.mxu1 %v2136_v0  ;;  %1531 = vmatprep.subr.bf16.mxu0 %v2136_v0 }
  0xd3   : > { %1552 = vmatpush3.bf16.msra.mxu1 %v1759_v13  ;;  %1532 = vmatpush3.bf16.msra.mxu0 %v1760_v14  ;;  %v1003_v13 = vld [vmem:[#allocation6] sm:$0xff] }
  0xd4   : > { %1553 = vmatprep.subr.bf16.mxu1 %v2136_v0  ;;  %1533 = vmatprep.subr.bf16.mxu0 %v2136_v0 }
  0xd7   : > { %1554 = vmatpush3.bf16.msra.mxu1 %v1761_v15  ;;  %1534 = vmatpush3.bf16.msra.mxu0 %v1762_v16 }
  0xd8   : > { %1585 = vmatprep.subr.bf16.mxu1 %v2136_v0  ;;  %1559 = vmatprep.subr.bf16.mxu0 %v2136_v0 }
  0xda   : > { %1556 = vmatmul.mubr.bf16.vlgmr.msra.gmra.mxu1 %v719_v17  ;;  %1536 = vmatmul.mubr.bf16.vlgmr.msra.gmra.mxu0 %v604_v18  ;;  %v1778_v18 = vld [vmem:[#allocation22] sm:$0xff]  }
  0xdb   : > { %1587 = vmatprep.mubr.msk.bf16.mxu1 %vm2137_vm0, %v2136_v0  ;;  %1560 = vmatpush3.bf16.msra.mxu0 %v1763_v19 }
  0xdc   : > { %1575 = vmatprep.mubr.msk.bf16.mxu0 %vm2137_vm0, %v2136_v0  ;;  %1561 = vmatprep.subr.bf16.mxu0 %v2136_v0 }
  0xdf   : > { %1562 = vmatpush3.bf16.msra.mxu0 %v1764_v20 }
  0xe0   : > { %1563 = vmatprep.subr.bf16.mxu0 %v2136_v0 }
  0xe3   : > { %1564 = vmatpush3.bf16.msra.mxu0 %v1765_v21 }
  0xe4   : > { %1565 = vmatprep.subr.bf16.mxu0 %v2136_v0 }
  0xe7   : > { %1566 = vmatpush3.bf16.msra.mxu0 %v1766_v22 }
  0xe8   : > { %1567 = vmatprep.subr.bf16.mxu0 %v2136_v0 }
  0xeb   : > { %1568 = vmatpush3.bf16.msra.mxu0 %v1767_v23 }
  0xec   : > { %1569 = vmatprep.subr.bf16.mxu0 %v2136_v0 }
  0xef   : > { %1570 = vmatpush3.bf16.msra.mxu0 %v1768_v24 }
  0xf0   : > { %1571 = vmatprep.subr.bf16.mxu0 %v2136_v0 }
  0xf3   : > { %1572 = vmatpush3.bf16.msra.mxu0 %v1769_v25 }
  0xf4   : > { %1573 = vmatprep.subr.bf16.mxu0 %v2136_v0 }
  0xf7   : > { %1574 = vmatpush3.bf16.msra.mxu0 %v1770_v26 }
  0xf8   : > { %1579 = vmatprep.subr.bf16.mxu0 %v2136_v0 }
  0xfa   : > { %1576 = vmatmul.mubr.bf16.vlgmr.msra.gmra.mxu0 %v828_v27 }
  0xfb   : > { %1581 = vmatprep.mubr.msk.bf16.mxu0 %vm2137_vm0, %v2136_v0 }
 0x19a   : > { %v818_v28 = vpop.f32.mrf.mxu1  ;;  %v703_v30 = vpop.f32.mrf.mxu0 }
 0x19b   : > { %v824_v29 = vpack.c.bf16 %v818_v28, %v818_v28  ;;  %v709_v31 = vpack.c.bf16 %v703_v30, %v703_v30 }
 0x19c   : > { %v1557_v32 = vpop.f32.mrf.mxu1  ;;  %v1537_v33 = vpop.f32.mrf.mxu0 }
 0x19d   : > { %827 = vst [vmem:[#allocation3] sm:$0xf] %v824_v29  ;;  %710 = vst [vmem:[#allocation2] sm:$0xf] %v709_v31  ;;  %v1186_v29 = vld [vmem:[%s2412_s23] sm:$0xff] }
 0x19e   : > { %v821_v34 = vpop.f32.mrf.mxu1  ;;  %v706_v35 = vpop.f32.mrf.mxu0 }
 0x1a0   : > { %v1558_v36 = vpop.f32.mrf.mxu1  ;;  %v1538_v37 = vpop.f32.mrf.mxu0 }
 0x1a4   : > { %v939_v38 = vld [vmem:[#allocation3] sm:$0xf]  ;;  %v943_v39 = vld [vmem:[#allocation2] sm:$0xf] }
 0x1a5   : > { %1580 = vmatpush3.bf16.xpose.msra.mxu0 %v939_v38 }
 0x1ac   : > { %1582 = vmatmul.mubr.bf16.vlgmr.msra.gmra.mxu0 %v943_v39 }
 0x1ba   : > { %v927_v40 = vpop.f32.mrf.mxu0 }
 0x1bb   : > { %v933_v41 = vpack.c.bf16 %v927_v40, %v927_v40 }
 0x1bc   : > { %v1577_v42 = vpop.f32.mrf.mxu0 }
 0x1bd   : > { %936 = vst [vmem:[#allocation4] sm:$0xf] %v933_v41 }
 0x1be   : > { %v930_v43 = vpop.f32.mrf.mxu0 }
 0x1c0   : > { %v1578_v44 = vpop.f32.mrf.mxu0 }
 0x1c4   : > { %v942_v45 = vld [vmem:[#allocation4] sm:$0xf] }
 0x1c5   : > { %v1024_v46 = vsel %vm1022_vm1, %v942_v45, 0 }
 0x1c6   : > { %1586 = vmatpush3.bf16.msra.mxu1 %v1024_v46 }
 0x1c7   : > { %1591 = vmatprep.subr.bf16.mxu1 %v2136_v0 }
 0x26c   : > { %v980_v50 = vpop.f32.mrf.mxu0 }
 0x26d   : > { %v981_v51 = vadd.f32 %v980_v50, %v945_v49 }
 0x26e   : > { %v1583_v52 = vpop.f32.mrf.mxu0 }
 0x26f   : > { %v988_v53 = vsel %vm987_vm3, %v981_v51, -inf }
 0x270   : > { %989 = vmax.xlane.f32.xlu0 %v988_v53  ;;  %v983_v54 = vpop.f32.mrf.mxu0 }
 0x272   : > { %v1584_v55 = vpop.f32.mrf.mxu0 }
 0x2f9   : > { %v990_v58 = vpop.xlane.xlu0 %989 }
 0x2fa   : > { %v991_v59 = vmax.f32 %v986_v57, %v990_v58 }
 0x2fc   : > { %v992_v60 = vsub.f32 %v986_v57, %v991_v59  ;;  %1068 = vst.msk [vmem:[#allocation5] sm:$0xff] %vm711_vm2, %v991_v59  ;;  %997 = vperm.xlu0 %1745, %v991_v59  }
 0x2fe   : > { %v993_v2 = vmul.f32 1.442695, %v992_v60 }
 0x377   : > { %v998_v61 = vpop.permute.xlu0 %997 }
 0x378   : > { %v1000_v62 = vsub.f32 %v981_v51, %v998_v61 }
 0x37a   : > { %v1001_v63 = vmul.f32 1.442695, %v1000_v62 }
 0x37c   : > { %1779 = vpow2.f32 %v1001_v63 }
 0x37d   : > { %1781 = vpow2.f32 %v993_v2 }
 0x389   : > { %v1780_v1 = vpop.eup %1779 }
 0x38a   : > { %v1005_v3 = vsel %vm987_vm3, %v1780_v1, 0.0  ;;  %v1018_v4 = vpack.c.bf16 %v1780_v1, %v1780_v1  ;;  %v1782_v5 = vpop.eup %1781 }
 0x38b   : > { %1006 = vadd.xlane.f32.xlu1 %v1005_v3  ;;  %v1004_v14 = vmul.f32 %v1782_v5, %v1003_v13 }
 0x38c   : > { %1588 = vmatmul.mubr.msk.bf16.vlgmr.msra.gmra.mxu1 %vm987_vm3, %v1018_v4 }
 0x38d   : > { %1607 = vmatprep.mubr.msk.bf16.mxu1 %vm2137_vm0, %v2136_v0  ;;  %1592 = vmatpush3.bf16.msra.mxu1 %v1771_v6 }
 0x38e   : > { %1593 = vmatprep.subr.bf16.mxu1 %v2136_v0 }
 0x391   : > { %1594 = vmatpush3.bf16.msra.mxu1 %v1772_v7 }
 0x392   : > { %1595 = vmatprep.subr.bf16.mxu1 %v2136_v0 }
 0x395   : > { %1596 = vmatpush3.bf16.msra.mxu1 %v1773_v8 }
 0x396   : > { %1597 = vmatprep.subr.bf16.mxu1 %v2136_v0 }
 0x399   : > { %1598 = vmatpush3.bf16.msra.mxu1 %v1774_v9 }
 0x39a   : > { %1599 = vmatprep.subr.bf16.mxu1 %v2136_v0 }
 0x39c   : > { %1014 = vperm.xlu1 %1746, %v1782_v5  }
 0x39d   : > { %1600 = vmatpush3.bf16.msra.mxu1 %v1775_v10 }
 0x39e   : > { %1601 = vmatprep.subr.bf16.mxu1 %v2136_v0 }
 0x3a1   : > { %1602 = vmatpush3.bf16.msra.mxu1 %v1776_v11 }
 0x3a2   : > { %1603 = vmatprep.subr.bf16.mxu1 %v2136_v0 }
 0x3a5   : > { %1604 = vmatpush3.bf16.msra.mxu1 %v1777_v12 }
 0x3a6   : > { %1605 = vmatprep.subr.bf16.mxu1 %v2136_v0 }
 0x3a9   : > { %1606 = vmatpush3.bf16.msra.mxu1 %v1778_v18 }
 0x414   : > { %v1007_v15 = vpop.xlane.xlu1 %1006 }
 0x415   : > { %v1008_v16 = vadd.f32 %v1007_v15, %v1004_v14 }
 0x417   : > { %1010 = vst.msk [vmem:[#allocation6] sm:$0xff] %vm711_vm2, %v1008_v16 }
 0x418   : > { %v1015_v0 = vpop.permute.xlu1 %1014 }
 0x419   : > { %v1017_v24 = vmul.f32 0.0, %v1015_v0 }
 0x41e   : > { %v1073_v17 = vld [vmem:[#allocation6] sm:$0xff] }
 0x41f   : > { %1783 = vrcp.f32 %v1073_v17 }
 0x42c   : > { %v1784_v19 = vpop.eup %1783 }
 0x42d   : > { %1077 = vperm.xlu1 %1746, %v1784_v19  }
 0x44c   : > { %v1060_v20 = vpop.f32.mrf.mxu1 }
 0x44d   : > { %v1066_v25 = vadd.f32 %v1060_v20, %v1017_v24 }
 0x44e   : > { %v1589_v21 = vpop.f32.mrf.mxu1 }
 0x450   : > { %v1063_v22 = vpop.f32.mrf.mxu1 }
 0x452   : > { %v1590_v23 = vpop.f32.mrf.mxu1 }
 0x4a8   : > { %v1078_v26 = vpop.permute.xlu1 %1077 }
 0x4a9   : > { %v1080_v27 = vmul.f32 %v1078_v26, %v1066_v25 }
 0x4ab   : > { %v1081_v28 = vpack.c.bf16 %v1080_v27, %v1080_v27 }
 0x4ad   : > { %1608 = vmatmul.mubr.bf16.vlgmr.msra.gmra.mxu1 %v1081_v28 }
 0x56d   : > { %v1180_v30 = vpop.f32.mrf.mxu1 }
 0x56e   : > { %v1187_v31 = vadd.f32 %v1186_v29, %v1180_v30 }
 0x56f   : > { %v1609_v32 = vpop.f32.mrf.mxu1 }
 0x570   : > { %1188 = vst [vmem:[%s590_s21] sm:$0xff] %v1187_v31 }
 0x571   : > { %v1183_v33 = vpop.f32.mrf.mxu1 }
 0x572   : > { %2040 = shalt.err (!%p2037_p2)
}
 0x573   : > { %s2041_s0 = scalar_lea.hbm %s2503_s1, 128  ;;  %s2045_s16 = scalar_lea.hbm %s2618_s9, 256 }
 0x574   : > { %p2042_p3 = scmp.ne.s32.totalorder %s2503_s1, %s2041_s0  ;;  %p2046_p12 = scmp.lt.s32.totalorder %s2503_s1, %s2618_s9 }
 0x575   : > { %p2047_p6 = scmp.lt.s32.totalorder %s2045_s16, %s2041_s0 }
 0x576   : > { %p2043_p7 = pnand %p2042_p3, %p2619_p10 }
 0x577   : > { %p2048_p0 = por %p2047_p6, %p2046_p12 }
 0x578   : > { %p2044_p11 = pneg %p2043_p7 }
 0x57a   : > { %p2049_p8 = pnand %p2048_p0, %p2044_p11 }
 0x57c   : > { %2052 = shalt.err (!%p2049_p8)
}
 0x57d   : > { %1639 = dma.vmem_to_hbm [thread:$0]  (%p2619_p10), %s2505_s7, 128, %s2503_s1, %s1190_s26   ;;  %v1610_v34 = vpop.f32.mrf.mxu1 }
 0x57e PF: > { %s2620_s5 = sld [smem:[#allocation30_spill]]  ;;  %p2621_p9 = scmp.ne.s32.totalorder %s2597_s15, 0 }
 0x57f   : > { %p2622_p4 = scmp.ge.s32.totalorder %s2123_s14, 2 }
 0x581   : > { %p1671_p5 = pnand %p2622_p4, %p2621_p9 }
 0x583   : > { %p1672_p13 = pneg %p1671_p5 }
 0x584   : > { %s1216_s13 = sand.u32 1, %s2620_s5  }
 0x585   : > { %s1217_s22 = scalar_lea.sflag [#allocation10], %s1216_s13 }
 0x586   : > { %2098 = dma.done.wait (%p1672_p13), %s1217_s22, 128  }
 0x587   : > { %2100 = vsyncadd (%p1672_p13), %s1217_s22, 4294967168  ;;  %s31_s14 = sadd.s32 1, %s2123_s14   ;;  %s2623_s28 = sld [smem:[#allocation31_spill]] }
 0x588   : > { %p28_p1 = scmp.ge.s32.totalorder %s31_s14, 4   ;;  %s2624_s11 = sld [smem:[#allocation35_spill]] }
 0x589   : > { %s2625_s12 = sld [smem:[#allocation33_spill]]  ;;  %s2627_s30 = smov %s2107_s10 }
 0x58a   : > { %s2626_s13 = sld [smem:[#allocation34_spill]]  ;;  %30 = sbr.rel (!%p28_p1) target bundleno = 18 (0x12), region = 174 }
 0x58d   : > { %s2628_s10 = smov %s2623_s28 }
 0x58f   :  { %1222 = vsyncpa [#allocation9], 1 }
 0x590   :  { %1224 = vsyncpa [#allocation9 + $0x1], 1 }
 0x591   :  { %1225 = vsyncpa [#allocation12], 1 }
 0x592   :  { %1227 = vsyncpa [#allocation12 + $0x1], 1 }
 0x593   :  { %1228 = vsyncpa [#allocation15], 1 }
 0x594   :  { %1230 = vsyncpa [#allocation15 + $0x1], 1 }
 0x595   :  { %1231 = vsyncpa [#allocation18], 1 }
 0x596   :  { %1232 = vsyncpa [#allocation21], 1 }
 0x597   :  { %1233 = vsyncpa [#allocation10], 1 }
 0x598   :  { %1235 = vsyncpa [#allocation10 + $0x1], 1 }

</bundles_post_ra>
